<compile_context>
chip_gen: v7x
topology: tpu7x:2x2x1
jax: 0.10.0
libtpu: 0.0.40
codegen_flags: <defaults>
</compile_context>

<pallas_src>
import jax
import jax.numpy as jnp
from jax.experimental import pallas as pl
from jax.experimental.pallas import tpu as pltpu


def _round_up(x: int, m: int) -> int:
    return ((x + m - 1) // m) * m


def patch_embed_kernel(patches_ref, w_ref, b_ref, out_ref):
    # (tm, K) @ (K, tn) on the MXU with f32 accumulation, f32 bias row add
    # (broadcast over the tm rows), cast to the output dtype.
    acc = jnp.dot(patches_ref[...], w_ref[...], preferred_element_type=jnp.float32)
    out_ref[...] = (acc + b_ref[...]).astype(out_ref.dtype)


def _pick_tm(M, sub, tm_target, per_row_bytes, fixed_bytes, budget):
    """Pick an M tile minimizing padding waste, subject to a VMEM budget."""
    if M <= 128:
        return _round_up(M, sub)                       # single block, minimal pad
    cands = [c for c in (512, 384, 256, 128) if c <= tm_target and c % sub == 0]
    if not cands:
        cands = [_round_up(128, sub)]
    fitting = [c for c in cands if fixed_bytes + c * per_row_bytes <= budget]
    if not fitting:
        fitting = [cands[-1]]
    # Minimize padded rows; break ties toward the larger tile.
    return min(fitting, key=lambda c: (_round_up(M, c), -c))


def patch_embedding(x, weight, bias, patch_size, *, compute_dtype=jnp.bfloat16,
                    tm_target=512, weight_resident_max_bytes=8 * 1024 * 1024,
                    input_buffer_count=2):
    """Equivalent of:
         y = Conv2d(C, E, kernel_size=P, stride=P)(x)   # x: (B, C, H, W)
         y = y.flatten(2).transpose(1, 2)               # -> (B, n_patches, E)
    """
    B, C, H, W = x.shape
    P = patch_size
    nh, nw = H // P, W // P
    n_patches = nh * nw
    E = weight.shape[0]
    out_dtype = x.dtype

    # Conv2d(stride=P) silently drops trailing pixels when H/W % P != 0.
    if H != nh * P or W != nw * P:
        x = x[:, :, :nh * P, :nw * P]

    # Cast BEFORE patchification so the materialized transposed copy (and all
    # downstream DMA) is half-width.  Accumulation stays f32 in the kernel.
    if compute_dtype is not None and x.dtype != compute_dtype:
        x = x.astype(compute_dtype)
    w_mat = weight.reshape(E, C * P * P).T              # (K, N)
    if compute_dtype is not None and w_mat.dtype != compute_dtype:
        w_mat = w_mat.astype(compute_dtype)

    # Patch extraction (layout glue).  Inner (C, P, P) ordering matches the
    # PyTorch conv-weight flattening so a plain matmul reproduces Conv2d.
    # TODO(synk): fold patchification into the kernel (grid over (B, nh) row
    # bands with a (1, C, P, W) in_spec) to avoid this materialized transpose;
    # the early bf16 cast above already halves its HBM cost.
    patches = (
        x.reshape(B, C, nh, P, nw, P)
        .transpose(0, 2, 4, 1, 3, 5)
        .reshape(B * n_patches, C * P * P)
    )
    b_row = bias.reshape(1, E).astype(jnp.float32)      # f32 bias row

    M, K = patches.shape
    N = E
    in_bytes = jnp.dtype(patches.dtype).itemsize
    out_bytes = jnp.dtype(out_dtype).itemsize
    sub = 16 if in_bytes == 2 else 8                    # bf16 sublane packing

    # Lane-align K and N (zero columns/rows contribute nothing to the GEMM).
    Kp = _round_up(K, 128)
    Np = _round_up(N, 128)

    weight_bytes = Kp * Np * in_bytes
    resident = weight_bytes <= weight_resident_max_bytes
    if resident:
        tn = Np                                         # whole-N output tile
    else:
        tn = 256 if Np % 256 == 0 else 128              # no tn-induced N pad

    # VMEM budget: double-buffered patches + output tiles, weight/bias buffers.
    per_row_bytes = 2 * Kp * in_bytes + 2 * tn * out_bytes
    fixed_bytes = 2 * (Kp * (Np if resident else tn)) * in_bytes + 2 * Np * 4
    budget = 28 * 1024 * 1024
    tm = _pick_tm(M, sub, tm_target, per_row_bytes, fixed_bytes, budget)
    Mp = _round_up(M, tm)
    vmem_est = fixed_bytes + tm * per_row_bytes
    vmem_limit = int(min(max(vmem_est + (8 << 20), 32 << 20), 56 << 20))

    # Pad only when needed (skip the extra HBM read+write copies otherwise).
    if (Mp, Kp) != (M, K):
        patches = jnp.pad(patches, ((0, Mp - M), (0, Kp - K)))
    if (Kp, Np) != (K, N):
        w_mat = jnp.pad(w_mat, ((0, Kp - K), (0, Np - N)))
    if Np != N:
        b_row = jnp.pad(b_row, ((0, 0), (0, Np - N)))

    pkw = {} if input_buffer_count <= 2 else {"pipeline_mode": pl.Buffered(input_buffer_count)}

    if resident:
        grid = (Mp // tm,)
        in_specs = [
            pl.BlockSpec((tm, Kp), lambda i: (i, 0), **pkw),    # streams over M
            pl.BlockSpec((Kp, Np), lambda i: (0, 0)),           # resident weight
            pl.BlockSpec((1, Np), lambda i: (0, 0)),            # resident bias
        ]
        out_spec = pl.BlockSpec((tm, Np), lambda i: (i, 0))
        dims = ("parallel",)
        weight_reads = 1
    else:
        grid = (Mp // tm, Np // tn)
        in_specs = [
            pl.BlockSpec((tm, Kp), lambda i, j: (i, 0), **pkw), # constant along j
            pl.BlockSpec((Kp, tn), lambda i, j: (0, j)),
            pl.BlockSpec((1, tn), lambda i, j: (0, j)),
        ]
        out_spec = pl.BlockSpec((tm, tn), lambda i, j: (i, j))
        dims = ("parallel", "arbitrary")                        # shard M, not N
        weight_reads = Mp // tm

    cost = pl.CostEstimate(
        flops=2 * Mp * Kp * Np,
        transcendentals=0,
        bytes_accessed=(Mp * Kp * in_bytes
                        + weight_reads * Kp * Np * in_bytes
                        + Np * 4
                        + Mp * Np * out_bytes),
    )

    out = pl.pallas_call(
        patch_embed_kernel,
        out_shape=jax.ShapeDtypeStruct((Mp, Np), out_dtype),
        grid_spec=pltpu.PrefetchScalarGridSpec(
            num_scalar_prefetch=0,
            grid=grid,
            in_specs=in_specs,
            out_specs=out_spec,
        ),
        compiler_params=pltpu.CompilerParams(
            dimension_semantics=dims,
            vmem_limit_bytes=vmem_limit),
        cost_estimate=cost,
    )(patches, w_mat, b_row)

    if (Mp, Np) != (M, N):
        out = out[:M, :N]
    return out.reshape(B, n_patches, E)


if __name__ == "__main__":
    # Small shapes consistent with the module: img_size=16, patch_size=4,
    # in_channels=4, embed_dim=32.
    B, C, H, W = 2, 4, 16, 16
    P, E = 4, 32

    key = jax.random.PRNGKey(0)
    kx, kw, kb = jax.random.split(key, 3)

    x = jax.random.normal(kx, (B, C, H, W), dtype=jnp.float32)
    # Conv2d weight shape: (embed_dim, in_channels, P, P); bias: (embed_dim,)
    weight = jax.random.normal(kw, (E, C, P, P), dtype=jnp.float32) * 0.02
    bias = jax.random.normal(kb, (E,), dtype=jnp.float32) * 0.02

    # Plain-JAX reference of the same math.
    nh, nw = H // P, W // P
    patches_ref = (
        x.reshape(B, C, nh, P, nw, P)
        .transpose(0, 2, 4, 1, 3, 5)
        .reshape(B * nh * nw, C * P * P)
    )
    ref = (patches_ref @ weight.reshape(E, -1).T + bias).reshape(B, nh * nw, E)

    # Default path: bf16 compute (MXU-peak dtype on v6e/v7x), f32 accumulation.
    out_bf16 = jax.block_until_ready(patch_embedding(x, weight, bias, P))
    assert out_bf16.shape == (B, nh * nw, E)
    assert jnp.allclose(out_bf16, ref, atol=5e-2, rtol=5e-2)

    # Full-precision path.
    out_f32 = jax.block_until_ready(
        patch_embedding(x, weight, bias, P, compute_dtype=None))
    assert out_f32.shape == (B, nh * nw, E)
    assert jnp.allclose(out_f32, ref, atol=1e-4, rtol=1e-4)

    print("KERNEL_OK")
</pallas_src>

<mosaic_0001>
module attributes {stable_mosaic.version = 11 : i64} {
  func.func @patch_embed_kernel(%arg0: i32, %arg1: memref<32x128xbf16, #tpu.memory_space<vmem>>, %arg2: memref<128x128xbf16, #tpu.memory_space<vmem>>, %arg3: memref<1x128xf32, #tpu.memory_space<vmem>>, %arg4: memref<32x128xf32, #tpu.memory_space<vmem>>) attributes {dimension_semantics = [#tpu.dimension_semantics<parallel>], iteration_bounds = array<i64: 1>, scalar_prefetch = 0 : i64, scratch_operands = 0 : i64, tpu.core_type = #tpu.core_type<tc>, window_params = [{transform_indices = @transform_0, window_bounds = array<i64: 32, 128>}, {pipeline_mode = #tpu.pipeline_mode<synchronous>, transform_indices = @transform_1, window_bounds = array<i64: 128, 128>}, {pipeline_mode = #tpu.pipeline_mode<synchronous>, transform_indices = @transform_2, window_bounds = array<i64: 1, 128>}, {transform_indices = @transform_3, window_bounds = array<i64: 32, 128>}]} {
    %c0 = arith.constant 0 : index
    %c0_0 = arith.constant 0 : index
    %0 = vector.load %arg1[%c0, %c0_0] : memref<32x128xbf16, #tpu.memory_space<vmem>>, vector<32x128xbf16>
    %c0_1 = arith.constant 0 : index
    %c0_2 = arith.constant 0 : index
    %1 = vector.load %arg2[%c0_1, %c0_2] : memref<128x128xbf16, #tpu.memory_space<vmem>>, vector<128x128xbf16>
    %cst = arith.constant dense<0.000000e+00> : vector<32x128xf32>
    %2 = tpu.matmul %0, %1, %cst {dimension_numbers = #tpu.dot_dimension_numbers<[1], [0], [0], [1], [0, 0, 1, 1], [], []>} : vector<32x128xbf16>, vector<128x128xbf16>, vector<32x128xf32> -> vector<32x128xf32>
    %c0_3 = arith.constant 0 : index
    %c0_4 = arith.constant 0 : index
    %3 = vector.load %arg3[%c0_3, %c0_4] : memref<1x128xf32, #tpu.memory_space<vmem>>, vector<1x128xf32>
    %4 = vector.broadcast %3 : vector<1x128xf32> to vector<32x128xf32>
    %5 = arith.addf %2, %4 : vector<32x128xf32>
    %c0_5 = arith.constant 0 : index
    %c0_6 = arith.constant 0 : index
    %6 = vector.load %arg4[%c0_5, %c0_6] : memref<32x128xf32, #tpu.memory_space<vmem>>, vector<32x128xf32>
    tpu.vector_store %arg4[%c0_5, %c0_6], %5 {strides = array<i32>} : memref<32x128xf32, #tpu.memory_space<vmem>>, vector<32x128xf32>,
    return
  }
  func.func @transform_0(%arg0: i32) -> (i32, i32) {
    %c0_i32 = arith.constant 0 : i32
    %c0_i32_0 = arith.constant 0 : i32
    return %arg0, %c0_i32 : i32, i32
  }
  func.func @transform_1(%arg0: i32) -> (i32, i32) {
    %c0_i32 = arith.constant 0 : i32
    %c0_i32_0 = arith.constant 0 : i32
    %c0_i32_1 = arith.constant 0 : i32
    return %c0_i32, %c0_i32_0 : i32, i32
  }
  func.func @transform_2(%arg0: i32) -> (i32, i32) {
    %c0_i32 = arith.constant 0 : i32
    %c0_i32_0 = arith.constant 0 : i32
    %c0_i32_1 = arith.constant 0 : i32
    return %c0_i32, %c0_i32_0 : i32, i32
  }
  func.func @transform_3(%arg0: i32) -> (i32, i32) {
    %c0_i32 = arith.constant 0 : i32
    %c0_i32_0 = arith.constant 0 : i32
    return %arg0, %c0_i32 : i32, i32
  }
}

</mosaic_0001>

<bundles_post_ra>
// kernel: tpu_custom_call.1
= control target key start
LH: loop header
LB: loop body
LE: loop exit
PB: predicated region body
PF: predicated region fallthrough
CT: control target
= control target key end

     0   :  { %8 = vsyncpa [#allocation3], 0  ;;  %s398_s0 = inlined_call_operand.hbm [shape: bf16[32,128], index: 0, kind: input, shape index: {}]   ;;  %s399_s1 = inlined_call_operand.hbm [shape: bf16[128,128], index: 1, kind: input, shape index: {}]   ;;  %s400_s2 = inlined_call_operand.vmem [shape: f32[1,128], index: 2, kind: input, shape index: {}]   ;;  %s401_s3 = inlined_call_operand.hbm [shape: f32[32,128], index: 3, kind: output, shape index: {}]  }
   0x1   :  { %9 = vsyncpa [#allocation6], 0 }
   0x2   :  { %10 = vsyncpa [#allocation4], 0  ;;  %s332_s12 = smov [#allocation2]   ;;  %s260_s16 = scalar_lea.hbm %s398_s0, 256 }
   0x3   :  { %s16_s13 = sshll.u32 %s332_s12, 4  ;;  %p261_p0 = scmp.ne.s32.totalorder %s398_s0, %s260_s16  ;;  %s17_s13 = int_to_ptr.vmem [resolvable:$true] %s16_s13 }
   0x4   :  { %p264_p1 = scmp.lt.u32.totalorder %s260_s16, %s398_s0 }
   0x6   :  { %p266_p2 = pnand %p264_p1, %p261_p0 }
   0x8   :  { %269 = shalt.err (!%p266_p2)
}
   0x9   :  { %s270_s21 = scalar_lea.vmem %s17_s13, 256  ;;  %p275_p4 = scmp.lt.s32.totalorder %s17_s13, %s17_s13 }
   0xa   :  { %p271_p3 = scmp.ne.s32.totalorder %s17_s13, %s270_s21  ;;  %p276_p5 = scmp.lt.s32.totalorder %s270_s21, %s270_s21 }
   0xc   :  { %p277_p6 = por %p276_p5, %p275_p4 }
   0xe   :  { %p278_p7 = pnand %p277_p6, %p271_p3 }
  0x10   :  { %281 = shalt.err (!%p278_p7)
}
  0x11   :  { %s333_s22 = smov 64   ;;  %s334_s23 = smov 4  }
  0x12   :  { %22 = dma.hbm_to_vmem [thread:$0]  %s398_s0, 256, %s17_s13, [#allocation3], %s333_s22, %s333_s22, %s334_s23  }
  0x13   :  { %s335_s26 = smov [#allocation5]   ;;  %s282_s30 = scalar_lea.hbm %s399_s1, 1024 }
  0x14   :  { %s28_s27 = sshll.u32 %s335_s26, 4  ;;  %p283_p8 = scmp.ne.s32.totalorder %s399_s1, %s282_s30  ;;  %s29_s27 = int_to_ptr.vmem [resolvable:$true] %s28_s27 }
  0x15   :  { %p286_p9 = scmp.lt.u32.totalorder %s282_s30, %s399_s1 }
  0x17   :  { %p288_p10 = pnand %p286_p9, %p283_p8 }
  0x19   :  { %291 = shalt.err (!%p288_p10)
}
  0x1a   :  { %s292_s8 = scalar_lea.vmem %s29_s27, 1024  ;;  %p297_p12 = scmp.lt.s32.totalorder %s29_s27, %s29_s27 }
  0x1b   :  { %p293_p11 = scmp.ne.s32.totalorder %s29_s27, %s292_s8  ;;  %p298_p13 = scmp.lt.s32.totalorder %s292_s8, %s292_s8 }
  0x1d   :  { %p299_p0 = por %p298_p13, %p297_p12 }
  0x1f   :  { %p300_p1 = pnand %p299_p0, %p293_p11 }
  0x21   :  { %303 = shalt.err (!%p300_p1)
}
  0x22   :  { %34 = dma.hbm_to_vmem [thread:$0]  %s399_s1, 1024, %s29_s27, [#allocation6], %s333_s22, %s333_s22, %s334_s23  }
  0x23   :  { %326 = dma.done.wait [#allocation3], 256  }
  0x24   :  { %327 = vsyncadd [#allocation3], 4294967040 }
  0x25   :  { %328 = dma.done.wait [#allocation6], 1024  }
  0x26   :  { %329 = vsyncadd [#allocation6], 4294966272  ;;  %v250_v0 = vld [vmem:[#allocation5] sm:$0xff]   ;;  %v251_v1 = vld [vmem:[#allocation5 + $0x8] sm:$0xff]   ;;  %s336_s11 = smov [#allocation7]  }
  0x27   :  { %223 = vmatprep.subr.bf16.mxu0 %v250_v0  ;;  %v252_v2 = vld [vmem:[#allocation5 + $0x10] sm:$0xff]   ;;  %v253_v3 = vld [vmem:[#allocation5 + $0x18] sm:$0xff]   ;;  %v254_v5 = vld [vmem:[#allocation5 + $0x20] sm:$0xff]   ;;  %s189_s12 = sshll.u32 %s336_s11, 4  ;;  %s190_s12 = int_to_ptr.vmem [resolvable:$true] %s189_s12 }
  0x28   :  { %224 = vmatpush3.bf16.msra.mxu0 %v250_v0  ;;  %v258_v4 = vld [vmem:[#allocation2] sm:$0xff]   ;;  %v255_v6 = vld [vmem:[#allocation5 + $0x28] sm:$0xff]   ;;  %v257_v8 = vld [vmem:[#allocation5 + $0x38] sm:$0xff]   ;;  %s304_s13 = scalar_lea.vmem %s190_s12, 512  ;;  %p309_p3 = scmp.lt.s32.totalorder %s190_s12, %s190_s12 }
  0x29   :  { %225 = vmatprep.subr.bf16.mxu0 %v251_v1  ;;  %239 = vmatprep.mubr.bf16.mxu0 %v258_v4  ;;  %v256_v7 = vld [vmem:[#allocation5 + $0x30] sm:$0xff]   ;;  %v259_v9 = vld [vmem:[#allocation2 + $0x8] sm:$0xff]   ;;  %p305_p2 = scmp.ne.s32.totalorder %s190_s12, %s304_s13  ;;  %p310_p4 = scmp.lt.s32.totalorder %s304_s13, %s304_s13 }
  0x2a   :  { %v202_v10 = vld [vmem:[%s400_s2] ss:$0 sm:$0xff] }
  0x2b   :  { %p311_p5 = por %p310_p4, %p309_p3 }
  0x2c   :  { %226 = vmatpush3.bf16.msra.mxu0 %v251_v1 }
  0x2d   :  { %227 = vmatprep.subr.bf16.mxu0 %v252_v2  ;;  %p312_p6 = pnand %p311_p5, %p305_p2 }
  0x30   :  { %228 = vmatpush3.bf16.msra.mxu0 %v252_v2 }
  0x31   :  { %229 = vmatprep.subr.bf16.mxu0 %v253_v3 }
  0x34   :  { %230 = vmatpush3.bf16.msra.mxu0 %v253_v3 }
  0x35   :  { %231 = vmatprep.subr.bf16.mxu0 %v254_v5 }
  0x38   :  { %232 = vmatpush3.bf16.msra.mxu0 %v254_v5 }
  0x39   :  { %233 = vmatprep.subr.bf16.mxu0 %v255_v6 }
  0x3c   :  { %234 = vmatpush3.bf16.msra.mxu0 %v255_v6 }
  0x3d   :  { %235 = vmatprep.subr.bf16.mxu0 %v256_v7 }
  0x40   :  { %236 = vmatpush3.bf16.msra.mxu0 %v256_v7 }
  0x41   :  { %237 = vmatprep.subr.bf16.mxu0 %v257_v8 }
  0x44   :  { %238 = vmatpush3.bf16.msra.mxu0 %v257_v8 }
  0x47   :  { %240 = vmatmul.mubr.bf16.vlgmr.msra.gmra.mrb[0].mxu0 %v259_v9 }
 0x11a   :  { %v241_v11 = vpop.f32.mrb[0].mxu0 }
 0x11b   :  { %v174_v12 = vadd.f32 %v241_v11, %v202_v10  ;;  %v165_v13 = vpop.f32.mrb[1].mxu0 }
 0x11c   :  { %v166_v14 = vadd.f32 %v202_v10, %v165_v13  ;;  %v242_v15 = vpop.f32.mrb[2].mxu0 }
 0x11d   :  { %182 = vst [vmem:[#allocation7 + $0x10] sm:$0xff] %v174_v12  ;;  %v177_v16 = vadd.f32 %v242_v15, %v202_v10  ;;  %v168_v17 = vpop.f32.mrb[3].mxu0 }
 0x11e   :  { %180 = vst [vmem:[#allocation7] sm:$0xff] %v166_v14  ;;  %v169_v18 = vadd.f32 %v202_v10, %v168_v17 }
 0x11f   :  { %183 = vst [vmem:[#allocation7 + $0x18] sm:$0xff] %v177_v16 }
 0x120   :  { %181 = vst [vmem:[#allocation7 + $0x8] sm:$0xff] %v169_v18 }
 0x121   :  { %315 = shalt.err (!%p312_p6)
}
 0x122   :  { %s316_s15 = scalar_lea.hbm %s401_s3, 512 }
 0x123   :  { %p317_p7 = scmp.ne.s32.totalorder %s401_s3, %s316_s15  ;;  %p320_p8 = scmp.lt.u32.totalorder %s316_s15, %s401_s3 }
 0x125   :  { %p322_p9 = pnand %p320_p8, %p317_p7 }
 0x127   :  { %325 = shalt.err (!%p322_p9)
}
 0x128   :  { %s337_s20 = smov 128   ;;  %s338_s21 = smov 8  }
 0x129   :  { %195 = dma.vmem_to_hbm [thread:$0]  %s190_s12, 512, %s401_s3, [#allocation4], %s337_s20, %s337_s20, %s338_s21  }
 0x12a   :  { %330 = dma.done.wait [#allocation4], 512  }
 0x12b   :  { %331 = vsyncadd [#allocation4], 4294966784 }
 0x12c   :  { %199 = vsyncpa [#allocation3], 1 }
 0x12d   :  { %200 = vsyncpa [#allocation6], 1 }
 0x12e   :  { %201 = vsyncpa [#allocation4], 1 }

</bundles_post_ra>
